<compile_context>
chip_gen: v6e
topology: v6e:2x2x1
jax: 0.10.0
libtpu: 0.0.40
codegen_flags: <defaults>
</compile_context>

<pallas_src>
import functools

import jax
import jax.numpy as jnp
from jax import lax
from jax.experimental import pallas as pl
from jax.experimental.pallas import tpu as pltpu


def _lse_gather_kernel(x_ref, tgt_ref, xt_ref, logz_ref, m_sc, l_sc, *,
                       hw_valid, ragged):
    """Single pass over the logits stream: per-class online log-sum-exp
    (softmax over the SAMPLE axis) fused with the target-class gather."""
    n = pl.program_id(0)
    t = pl.program_id(1)
    n_n = pl.num_programs(0)
    n_t = pl.num_programs(1)
    C, TM = x_ref.shape

    @pl.when((n == 0) & (t == 0))
    def _init():
        m_sc[...] = jnp.full_like(m_sc, -jnp.inf)
        l_sc[...] = jnp.zeros_like(l_sc)

    x = x_ref[...].astype(jnp.float32)              # cast after load (bf16 stream OK)
    tgt = tgt_ref[...]                              # (1, TM) int32

    # target-class gather via one-hot over the class (sublane) axis
    cls = lax.broadcasted_iota(jnp.int32, (C, TM), 0)
    onehot = (cls == tgt).astype(jnp.float32)
    xt_ref[...] = jnp.sum(x * onehot, axis=0, keepdims=True)     # (1, TM)

    def lse_update(xm):
        m_old = m_sc[...]
        m_new = jnp.maximum(m_old, jnp.max(xm, axis=1, keepdims=True))
        l_sc[...] = (l_sc[...] * jnp.exp(m_old - m_new)
                     + jnp.sum(jnp.exp(xm - m_new), axis=1, keepdims=True))
        m_sc[...] = m_new

    if ragged:                                      # static: HW % t_hw != 0
        is_edge = t == n_t - 1

        @pl.when(jnp.logical_not(is_edge))
        def _interior():                            # unmasked fast path
            lse_update(x)

        @pl.when(is_edge)
        def _edge():                                # mask padded lanes of last HW tile
            lane = t * TM + lax.broadcasted_iota(jnp.int32, (1, TM), 1)
            lse_update(jnp.where(lane < hw_valid, x, -1e30))
    else:
        lse_update(x)

    @pl.when((n == n_n - 1) & (t == n_t - 1))
    def _finalize():
        logz_ref[...] = m_sc[...] + jnp.log(l_sc[...])


def _focal_loss_kernel(xt_ref, tgt_ref, logz_ref, alpha_ref, out_ref, acc_sc, *,
                       gamma, size_average, use_alpha, m_valid, ragged):
    """Tiny second pass over the gathered (1, M) stream: finish the loss."""
    t = pl.program_id(0)
    n_t = pl.num_programs(0)
    C = logz_ref.shape[0]
    TM = xt_ref.shape[1]

    @pl.when(t == 0)
    def _init():
        acc_sc[...] = jnp.zeros_like(acc_sc)

    xt = xt_ref[...]                                # (1, TM) f32: x at target class
    tgt = tgt_ref[...]                              # (1, TM) int32

    # shared one-hot: gathers log_z[tgt] (and alpha[tgt])
    cls = lax.broadcasted_iota(jnp.int32, (C, TM), 0)
    onehot = (cls == tgt).astype(jnp.float32)
    logz_t = jnp.sum(logz_ref[...] * onehot, axis=0, keepdims=True)
    logpt = xt - logz_t                             # log_softmax gathered value
    pt = jnp.exp(logpt)

    if use_alpha:
        at = jnp.sum(alpha_ref[...] * onehot, axis=0, keepdims=True)
        logpt = logpt * at

    one_m_pt = 1.0 - pt
    g = float(gamma)
    if g.is_integer() and 0.0 <= g <= 8.0:
        mod = jnp.ones_like(pt)
        for _ in range(int(g)):                     # integer gamma: VPU multiplies
            mod = mod * one_m_pt
    else:
        mod = one_m_pt ** g

    loss = -mod * logpt                             # (1, TM)
    if ragged:                                      # static: M % tm != 0
        lane = t * TM + lax.broadcasted_iota(jnp.int32, (1, TM), 1)
        loss = jnp.where(lane < m_valid, loss, 0.0)
    acc_sc[...] += jnp.sum(loss, axis=1, keepdims=True)

    @pl.when(t == n_t - 1)
    def _finalize():
        total = acc_sc[...]
        if size_average:
            total = total / float(m_valid)
        out_ref[...] = total


def focal_loss(logits, target, gamma=0.0, alpha=None, size_average=True,
               tile_hw=None, tile_m=None):
    """Pallas TPU implementation of FocalLoss.forward."""
    x = jnp.asarray(logits)
    if x.ndim > 2:
        N, C = int(x.shape[0]), int(x.shape[1])
        HW = 1
        for d in x.shape[2:]:
            HW *= int(d)
        x3 = x.reshape(N, C, HW)                    # free view of contiguous NCHW input
    else:
        # 2-D (M, C) path: class axis must sit on sublanes -> small transpose copy.
        m_samples, C = int(x.shape[0]), int(x.shape[1])
        N, HW = 1, m_samples
        x3 = x.T.reshape(1, C, HW)
    M = N * HW
    tgt3 = jnp.asarray(target).reshape(N, 1, HW).astype(jnp.int32)

    # alpha -> dense (C, 1) column (zero-padded if shorter than C; PyTorch would
    # raise on such an out-of-range gather).
    use_alpha = alpha is not None
    if isinstance(alpha, (float, int)) and not isinstance(alpha, bool):
        a_vec = jnp.array([float(alpha), 1.0 - float(alpha)], jnp.float32)
    elif alpha is None:
        a_vec = jnp.zeros((1,), jnp.float32)
    else:
        a_vec = jnp.asarray(alpha, jnp.float32).reshape(-1)
    n_copy = min(C, int(a_vec.shape[0]))
    alpha_arr = jnp.zeros((C, 1), jnp.float32).at[:n_copy, 0].set(a_vec[:n_copy])

    # ---- kernel 1: stream logits once (native dtype), online LSE + gather ----
    itemsize = jnp.dtype(x3.dtype).itemsize
    if tile_hw is None:
        stream_target = 2 * 1024 * 1024                     # ~2 MiB per x tile buffer
        vmem_budget = 20 * 1024 * 1024                      # headroom inside v7x's 32 MiB scoped VMEM
        per_lane = 2 * C * itemsize + 4 * 4 * C + 3 * 4     # dbl-buffered x + f32 temps + tgt/out
        t_hw = min(stream_target // max(1, C * itemsize),
                   vmem_budget // max(1, per_lane))
        t_hw = max(128, (t_hw // 128) * 128)
    else:
        t_hw = max(128, (int(tile_hw) // 128) * 128)
    if t_hw >= HW:
        t_hw = HW                                            # full-extent lane block
    num_t = -(-HW // t_hw)
    ragged1 = (HW % t_hw) != 0

    cost1 = pl.CostEstimate(
        flops=int(8 * M * C),
        transcendentals=int(M * C),
        bytes_accessed=int(M * C * itemsize + 2 * M * 4 + C * 4),
    )
    x_tgt, log_z = pl.pallas_call(
        functools.partial(_lse_gather_kernel, hw_valid=HW, ragged=ragged1),
        out_shape=(jax.ShapeDtypeStruct((N, 1, HW), jnp.float32),
                   jax.ShapeDtypeStruct((C, 1), jnp.float32)),
        grid_spec=pltpu.PrefetchScalarGridSpec(
            num_scalar_prefetch=0,
            grid=(N, num_t),
            in_specs=[
                pl.BlockSpec((None, C, t_hw), lambda n, t: (n, 0, t)),   # logits (C, t_hw)
                pl.BlockSpec((None, 1, t_hw), lambda n, t: (n, 0, t)),   # target
            ],
            out_specs=(
                pl.BlockSpec((None, 1, t_hw), lambda n, t: (n, 0, t)),   # gathered x[tgt]
                pl.BlockSpec((C, 1), lambda n, t: (0, 0)),               # per-class log Z
            ),
            scratch_shapes=[pltpu.VMEM((C, 1), jnp.float32),             # running max
                            pltpu.VMEM((C, 1), jnp.float32)],            # running sum-exp
        ),
        compiler_params=pltpu.CompilerParams(
            dimension_semantics=("arbitrary", "arbitrary"),
            vmem_limit_bytes=32 * 1024 * 1024,
        ),
        cost_estimate=cost1,
    )(x3, tgt3)

    # ---- kernel 2: tiny focal-loss reduction over the (1, M) gathered stream ----
    xt_flat = x_tgt.reshape(1, M)
    tgt_flat = tgt3.reshape(1, M)
    if tile_m is None:
        budget2 = 8 * 1024 * 1024
        per_lane2 = 2 * (4 + 4) + 3 * 4 * C + 8              # dbl-buffered xt+tgt + one-hot temps
        tm2 = max(128, (budget2 // per_lane2 // 128) * 128)
    else:
        tm2 = max(128, (int(tile_m) // 128) * 128)
    if tm2 >= M:
        tm2 = M
    num_t2 = -(-M // tm2)
    ragged2 = (M % tm2) != 0

    cost2 = pl.CostEstimate(
        flops=int(M * (3 * C + 12)),
        transcendentals=int(2 * M),
        bytes_accessed=int(M * 8 + 2 * C * 4 + 4),
    )
    out = pl.pallas_call(
        functools.partial(_focal_loss_kernel, gamma=float(gamma),
                          size_average=bool(size_average), use_alpha=use_alpha,
                          m_valid=M, ragged=ragged2),
        out_shape=jax.ShapeDtypeStruct((1, 1), jnp.float32),
        grid_spec=pltpu.PrefetchScalarGridSpec(
            num_scalar_prefetch=0,
            grid=(num_t2,),
            in_specs=[
                pl.BlockSpec((1, tm2), lambda t: (0, t)),    # gathered logits
                pl.BlockSpec((1, tm2), lambda t: (0, t)),    # target
                pl.BlockSpec((C, 1), lambda t: (0, 0)),      # per-class log Z (resident)
                pl.BlockSpec((C, 1), lambda t: (0, 0)),      # alpha (resident)
            ],
            out_specs=pl.BlockSpec((1, 1), lambda t: (0, 0)),
            scratch_shapes=[pltpu.VMEM((1, 1), jnp.float32)],
        ),
        compiler_params=pltpu.CompilerParams(
            dimension_semantics=("arbitrary",),
            vmem_limit_bytes=32 * 1024 * 1024,
        ),
        cost_estimate=cost2,
    )(xt_flat, tgt_flat, log_z, alpha_arr)
    return out[0, 0]


def _focal_loss_ref(logits, target, gamma=0.0, alpha=None, size_average=True):
    """Pure-JAX reference mirroring the PyTorch module (for checking)."""
    x = jnp.asarray(logits)
    if x.ndim > 2:
        N, C = x.shape[0], x.shape[1]
        x = x.reshape(N, C, -1).transpose(0, 2, 1).reshape(-1, C)
    x = x.astype(jnp.float32)
    C = x.shape[1]
    t = jnp.asarray(target).reshape(-1).astype(jnp.int32)
    logsm = jax.nn.log_softmax(x, axis=0)           # dim=0, as in the module
    logpt = jnp.take_along_axis(logsm, t[:, None], axis=1)[:, 0]
    pt = jnp.exp(logpt)
    if alpha is not None:
        if isinstance(alpha, (float, int)) and not isinstance(alpha, bool):
            a = jnp.array([float(alpha), 1.0 - float(alpha)], jnp.float32)
        else:
            a = jnp.asarray(alpha, jnp.float32).reshape(-1)
        a_full = jnp.zeros((C,), jnp.float32).at[:min(C, a.shape[0])].set(
            a[:min(C, a.shape[0])])
        logpt = logpt * a_full[t]
    loss = -1.0 * (1.0 - pt) ** float(gamma) * logpt
    return loss.mean() if size_average else loss.sum()


if __name__ == "__main__":
    key = jax.random.PRNGKey(0)
    ks = jax.random.split(key, 8)

    # NCHW logits + NHW integer target, small shapes consistent with the module.
    N, C, H, W = 2, 4, 16, 16
    logits = jax.random.normal(ks[0], (N, C, H, W), dtype=jnp.float32)
    target = jax.random.randint(ks[1], (N, H, W), 0, C, dtype=jnp.int32)

    checks = [
        # (logits, target, gamma, alpha, size_average, tile_hw, tile_m)
        (logits, target, 2.0, [0.1, 0.2, 0.3, 0.4], True, None, None),  # single-tile path
        (logits, target, 2.0, [0.1, 0.2, 0.3, 0.4], True, 128, 256),    # multi-tile both kernels
        (logits, target, 0.0, None, True, 128, None),                   # no alpha, gamma 0
    ]

    # ragged tiles: H*W = 324 not a multiple of the 128-lane tile (masking path)
    H2, W2 = 18, 18
    logits2 = jax.random.normal(ks[2], (N, C, H2, W2), dtype=jnp.float32)
    target2 = jax.random.randint(ks[3], (N, H2, W2), 0, C, dtype=jnp.int32)
    checks.append((logits2, target2, 2.0, [0.1, 0.2, 0.3, 0.4], True, 128, 256))

    # native bf16 streaming path (no wrapper cast; kernel casts after load)
    checks.append((logits.astype(jnp.bfloat16), target, 2.0,
                   [0.1, 0.2, 0.3, 0.4], True, None, None))

    # 2-D input path, scalar alpha (binary), non-integer gamma, sum reduction
    logits3 = jax.random.normal(ks[4], (40, 2), dtype=jnp.float32)
    target3 = jax.random.randint(ks[5], (40,), 0, 2, dtype=jnp.int32)
    checks.append((logits3, target3, 1.5, 0.25, False, None, None))

    for (lg, tg, gamma, alpha, size_average, tile_hw, tile_m) in checks:
        out = focal_loss(lg, tg, gamma=gamma, alpha=alpha,
                         size_average=size_average, tile_hw=tile_hw, tile_m=tile_m)
        out = jax.block_until_ready(out)
        ref = _focal_loss_ref(lg, tg, gamma=gamma, alpha=alpha,
                              size_average=size_average)
        assert jnp.allclose(out, ref, rtol=1e-4, atol=1e-5), \
            (gamma, alpha, size_average, tile_hw, tile_m, out, ref)

    print("KERNEL_OK")
</pallas_src>

<mosaic_0001>
module attributes {stable_mosaic.version = 11 : i64} {
  func.func @_lse_gather_kernel(%arg0: i32, %arg1: i32, %arg2: memref<1x4x256xf32, #tpu.memory_space<vmem>>, %arg3: memref<1x1x256xi32, #tpu.memory_space<vmem>>, %arg4: memref<1x1x256xf32, #tpu.memory_space<vmem>>, %arg5: memref<4x1xf32, #tpu.memory_space<vmem>>, %arg6: memref<4x1xf32, #tpu.memory_space<vmem>>, %arg7: memref<4x1xf32, #tpu.memory_space<vmem>>) attributes {dimension_semantics = [#tpu.dimension_semantics<arbitrary>, #tpu.dimension_semantics<arbitrary>], iteration_bounds = array<i64: 2, 1>, scalar_prefetch = 0 : i64, scratch_operands = 2 : i64, tpu.core_type = #tpu.core_type<tc>, window_params = [{transform_indices = @transform_0, window_bounds = array<i64: 1, 4, 256>}, {transform_indices = @transform_1, window_bounds = array<i64: 1, 1, 256>}, {transform_indices = @transform_2, window_bounds = array<i64: 1, 1, 256>}, {pipeline_mode = #tpu.pipeline_mode<synchronous>, transform_indices = @transform_3, window_bounds = array<i64: 4, 1>}]} {
    %c0_i32 = arith.constant 0 : i32
    %0 = arith.cmpi eq, %arg0, %c0_i32 : i32
    %c0_i32_0 = arith.constant 0 : i32
    %1 = arith.cmpi eq, %arg1, %c0_i32_0 : i32
    %2 = arith.andi %0, %1 : i1
    %3 = arith.extui %2 : i1 to i32
    %c0_i32_1 = arith.constant 0 : i32
    %4 = arith.cmpi ne, %3, %c0_i32_1 : i32
    scf.if %4 {
      %cst_22 = arith.constant 0xFF800000 : f32
      %41 = vector.broadcast %cst_22 : f32 to vector<4x1xf32>
      %c0_23 = arith.constant 0 : index
      %c0_24 = arith.constant 0 : index
      %42 = vector.load %arg6[%c0_23, %c0_24] : memref<4x1xf32, #tpu.memory_space<vmem>>, vector<4x1xf32>
      tpu.vector_store %arg6[%c0_23, %c0_24], %41 {strides = array<i32>} : memref<4x1xf32, #tpu.memory_space<vmem>>, vector<4x1xf32>,
      %cst_25 = arith.constant 0.000000e+00 : f32
      %43 = vector.broadcast %cst_25 : f32 to vector<4x1xf32>
      %c0_26 = arith.constant 0 : index
      %c0_27 = arith.constant 0 : index
      %44 = vector.load %arg7[%c0_26, %c0_27] : memref<4x1xf32, #tpu.memory_space<vmem>>, vector<4x1xf32>
      tpu.vector_store %arg7[%c0_26, %c0_27], %43 {strides = array<i32>} : memref<4x1xf32, #tpu.memory_space<vmem>>, vector<4x1xf32>,
    } else {
    }
    %c0 = arith.constant 0 : index
    %c0_2 = arith.constant 0 : index
    %c0_3 = arith.constant 0 : index
    %5 = vector.load %arg2[%c0, %c0_2, %c0_3] : memref<1x4x256xf32, #tpu.memory_space<vmem>>, vector<1x4x256xf32>
    %6 = vector.shape_cast %5 : vector<1x4x256xf32> to vector<4x256xf32>
    %c0_4 = arith.constant 0 : index
    %c0_5 = arith.constant 0 : index
    %c0_6 = arith.constant 0 : index
    %7 = vector.load %arg3[%c0_4, %c0_5, %c0_6] : memref<1x1x256xi32, #tpu.memory_space<vmem>>, vector<1x1x256xi32>
    %8 = vector.shape_cast %7 : vector<1x1x256xi32> to vector<1x256xi32>
    %9 = tpu.iota {dimensions = array<i32: 0>} : vector<4x256xi32>
    %10 = vector.broadcast %8 : vector<1x256xi32> to vector<4x256xi32>
    %11 = arith.cmpi eq, %9, %10 : vector<4x256xi32>
    %12 = arith.extui %11 : vector<4x256xi1> to vector<4x256xi32>
    %13 = arith.sitofp %12 : vector<4x256xi32> to vector<4x256xf32>
    %14 = arith.mulf %6, %13 : vector<4x256xf32>
    %cst = arith.constant dense<0.000000e+00> : vector<256xf32>
    %15 = vector.multi_reduction <add>, %14, %cst [0] : vector<4x256xf32> to vector<256xf32>
    %16 = vector.shape_cast %15 : vector<256xf32> to vector<1x256xf32>
    %c0_7 = arith.constant 0 : index
    %c0_8 = arith.constant 0 : index
    %c0_9 = arith.constant 0 : index
    %17 = vector.load %arg4[%c0_7, %c0_8, %c0_9] : memref<1x1x256xf32, #tpu.memory_space<vmem>>, vector<1x1x256xf32>
    %18 = vector.shape_cast %17 : vector<1x1x256xf32> to vector<1x256xf32>
    %19 = vector.shape_cast %16 : vector<1x256xf32> to vector<1x1x256xf32>
    tpu.vector_store %arg4[%c0_7, %c0_8, %c0_9], %19 {strides = array<i32>} : memref<1x1x256xf32, #tpu.memory_space<vmem>>, vector<1x1x256xf32>,
    %c0_10 = arith.constant 0 : index
    %c0_11 = arith.constant 0 : index
    %20 = vector.load %arg6[%c0_10, %c0_11] : memref<4x1xf32, #tpu.memory_space<vmem>>, vector<4x1xf32>
    %cst_12 = arith.constant dense<0xFF800000> : vector<4xf32>
    %21 = vector.multi_reduction <maximumf>, %6, %cst_12 [1] : vector<4x256xf32> to vector<4xf32>
    %22 = vector.shape_cast %21 : vector<4xf32> to vector<4x1xf32>
    %23 = arith.maximumf %20, %22 : vector<4x1xf32>
    %c0_13 = arith.constant 0 : index
    %c0_14 = arith.constant 0 : index
    %24 = vector.load %arg7[%c0_13, %c0_14] : memref<4x1xf32, #tpu.memory_space<vmem>>, vector<4x1xf32>
    %25 = arith.subf %20, %23 : vector<4x1xf32>
    %26 = math.exp %25 : vector<4x1xf32>
    %27 = arith.mulf %24, %26 : vector<4x1xf32>
    %28 = vector.broadcast %23 : vector<4x1xf32> to vector<4x256xf32>
    %29 = arith.subf %6, %28 : vector<4x256xf32>
    %30 = math.exp %29 : vector<4x256xf32>
    %cst_15 = arith.constant dense<0.000000e+00> : vector<4xf32>
    %31 = vector.multi_reduction <add>, %30, %cst_15 [1] : vector<4x256xf32> to vector<4xf32>
    %32 = vector.shape_cast %31 : vector<4xf32> to vector<4x1xf32>
    %33 = arith.addf %27, %32 : vector<4x1xf32>
    %c0_16 = arith.constant 0 : index
    %c0_17 = arith.constant 0 : index
    %34 = vector.load %arg7[%c0_16, %c0_17] : memref<4x1xf32, #tpu.memory_space<vmem>>, vector<4x1xf32>
    tpu.vector_store %arg7[%c0_16, %c0_17], %33 {strides = array<i32>} : memref<4x1xf32, #tpu.memory_space<vmem>>, vector<4x1xf32>,
    %c0_18 = arith.constant 0 : index
    %c0_19 = arith.constant 0 : index
    %35 = vector.load %arg6[%c0_18, %c0_19] : memref<4x1xf32, #tpu.memory_space<vmem>>, vector<4x1xf32>
    tpu.vector_store %arg6[%c0_18, %c0_19], %23 {strides = array<i32>} : memref<4x1xf32, #tpu.memory_space<vmem>>, vector<4x1xf32>,
    %c1_i32 = arith.constant 1 : i32
    %36 = arith.cmpi eq, %arg0, %c1_i32 : i32
    %c0_i32_20 = arith.constant 0 : i32
    %37 = arith.cmpi eq, %arg1, %c0_i32_20 : i32
    %38 = arith.andi %36, %37 : i1
    %39 = arith.extui %38 : i1 to i32
    %c0_i32_21 = arith.constant 0 : i32
    %40 = arith.cmpi ne, %39, %c0_i32_21 : i32
    scf.if %40 {
      %c0_22 = arith.constant 0 : index
      %c0_23 = arith.constant 0 : index
      %41 = vector.load %arg6[%c0_22, %c0_23] : memref<4x1xf32, #tpu.memory_space<vmem>>, vector<4x1xf32>
      %c0_24 = arith.constant 0 : index
      %c0_25 = arith.constant 0 : index
      %42 = vector.load %arg7[%c0_24, %c0_25] : memref<4x1xf32, #tpu.memory_space<vmem>>, vector<4x1xf32>
      %43 = math.log %42 : vector<4x1xf32>
      %44 = arith.addf %41, %43 : vector<4x1xf32>
      %c0_26 = arith.constant 0 : index
      %c0_27 = arith.constant 0 : index
      %45 = vector.load %arg5[%c0_26, %c0_27] : memref<4x1xf32, #tpu.memory_space<vmem>>, vector<4x1xf32>
      tpu.vector_store %arg5[%c0_26, %c0_27], %44 {strides = array<i32>} : memref<4x1xf32, #tpu.memory_space<vmem>>, vector<4x1xf32>,
    } else {
    }
    return
  }
  func.func @transform_0(%arg0: i32, %arg1: i32) -> (i32, i32, i32) {
    %c0_i32 = arith.constant 0 : i32
    %c0_i32_0 = arith.constant 0 : i32
    return %arg0, %c0_i32, %arg1 : i32, i32, i32
  }
  func.func @transform_1(%arg0: i32, %arg1: i32) -> (i32, i32, i32) {
    %c0_i32 = arith.constant 0 : i32
    %c0_i32_0 = arith.constant 0 : i32
    return %arg0, %c0_i32, %arg1 : i32, i32, i32
  }
  func.func @transform_2(%arg0: i32, %arg1: i32) -> (i32, i32, i32) {
    %c0_i32 = arith.constant 0 : i32
    %c0_i32_0 = arith.constant 0 : i32
    return %arg0, %c0_i32, %arg1 : i32, i32, i32
  }
  func.func @transform_3(%arg0: i32, %arg1: i32) -> (i32, i32) {
    %c0_i32 = arith.constant 0 : i32
    %c0_i32_0 = arith.constant 0 : i32
    %c0_i32_1 = arith.constant 0 : i32
    return %c0_i32, %c0_i32_0 : i32, i32
  }
}

</mosaic_0001>

<bundles_post_ra>
// kernel: tpu_custom_call.1
= control target key start
LH: loop header
LB: loop body
LE: loop exit
PB: predicated region body
PF: predicated region fallthrough
CT: control target
= control target key end

     0   :  { %9 = vsyncpa [#allocation5], 0  ;;  %s969_s0 = inlined_call_operand.hbm [shape: f32[2,4,256], index: 0, kind: input, shape index: {}]   ;;  %s970_s1 = inlined_call_operand.hbm [shape: s32[2,1,256], index: 1, kind: input, shape index: {}]   ;;  %s971_s2 = inlined_call_operand.hbm [shape: f32[2,1,256], index: 2, kind: output, shape index: {0}]   ;;  %s972_s3 = inlined_call_operand.vmem [shape: f32[4,1], index: 3, kind: output, shape index: {1}]  }
   0x1   :  { %11 = vsyncpa [#allocation5 + $0x1], 0 }
   0x2   :  { %12 = vsyncpa [#allocation8], 0 }
   0x3   :  { %14 = vsyncpa [#allocation8 + $0x1], 0 }
   0x4   :  { %15 = vsyncpa [#allocation6], 0 }
   0x5   :  { %17 = vsyncpa [#allocation6 + $0x1], 0  ;;  %s787_s12 = smov 0   ;;  %s789_s13 = smov 0  }
   0x6   :  { %s791_s14 = smov 0   ;;  %s793_s15 = smov 0  }
   0x7   :  { %s795_s16 = smov 0   ;;  %s797_s17 = smov 0  }
   0x8 LB: > { %s507_s18 = sadd.s32 4294967295, %s756_s17   ;;  %s508_s19 = sadd.s32 4294967294, %s756_s17   ;;  %s756_s17 = sphi %s797_s17, %s23_s17   ;;  %s752_s16 = sphi %s795_s16, %s984_s16   ;;  %s748_s15 = sphi %s793_s15, %s983_s15   ;;  %s744_s14 = sphi %s791_s14, %s982_s14   ;;  %s740_s13 = sphi %s789_s13, %s981_s13   ;;  %s736_s12 = sphi %s787_s12, %s980_s12  }
   0x9   : > { %s35_s20 = sadd.s32 1, %s752_s16  ;;  %s44_s21 = sadd.s32 1, %s744_s14 }
   0xa   : > { %p37_p0 = scmp.ge.s32.totalorder %s35_s20, 2  ;;  %p51_p1 = scmp.ne.s32.totalorder %s744_s14, %s740_s13 }
   0xb   : > { %p52_p2 = scmp.eq.s32.totalorder %s756_s17, 0  ;;  %p57_p3 = scmp.ne.s32.totalorder %s740_s13, %s736_s12 }
   0xc   : > { %s986_s20 = smov (%p37_p0, %s35_s20), 0  ;;  %p58_p5 = scmp.eq.s32.totalorder %s507_s18, 0 }
   0xd   : > { %p828_p4 = por %p52_p2, %p51_p1  ;;  %s39_s23 = ssub.s32 %s752_s16, %s986_s20 }
   0xe   : > { %p111_p6 = scmp.eq.s32.totalorder %s507_s18, 1  ;;  %p42_p7 = scmp.eq.s32.totalorder %s39_s23, 0 }
   0xf   : > { %p834_p8 = por %p58_p5, %p57_p3  ;;  %p117_p10 = scmp.eq.s32.totalorder %s508_s19, 1 }
  0x10   : > { %p838_p9 = por %p111_p6, %p51_p1  ;;  %p552_p13 = scmp.lt.s32.totalorder %s756_s17, 2 }
  0x11   : > { %s843_s26 = scalar_select %p42_p7, %s744_s14, %s44_s21  }
  0x12   : > { %p845_p11 = por %p117_p10, %p57_p3  ;;  %s852_s28 = sand.u32 1, %s744_s14  }
  0x13   : > { %s511_s29 = sshll.u32 %s852_s28, 3  ;;  %s530_s30 = sshll.u32 %s752_s16, 7 }
  0x14   : > { %s170_s6 = scalar_lea.hbm %s969_s0, %s530_s30  ;;  %s162_s7 = scalar_lea.vmem [#allocation4], %s511_s29 }
  0x15   : > { %s172_s8 = sshll.u32 %s162_s7, 4  ;;  %p861_p0 = pnand %p552_p13, %p828_p4  ;;  %s173_s8 = int_to_ptr.vmem [resolvable:$true] %s172_s8 }
  0x16   : > { %p517_p1 = scmp.ge.s32.totalorder %s756_s17, 1  ;;  %p198_p2 = scmp.lt.s32.totalorder %s756_s17, 3 }
  0x17   : > { %s159_s10 = scalar_lea.sflag [#allocation5], %s852_s28  ;;  %p618_p3 = pneg %p861_p0 }
  0x18   : > { %s629_s11 = scalar_lea.vmem %s173_s8, 128  ;;  %s758_s18 = smov [#allocation4]  }
  0x19   : > { %p630_p5 = scmp.ne.s32.totalorder %s173_s8, %s629_s11  ;;  %s634_s19 = sshll.u32 %s758_s18, 4  ;;  %s635_s19 = int_to_ptr.vmem [resolvable:$false] %s634_s19 }
  0x1a   : > { %s636_s21 = scalar_lea.vmem %s635_s19, 256  ;;  %p637_p4 = scmp.lt.s32.totalorder %s173_s8, %s635_s19 }
  0x1b   : > { %p632_p6 = pnand %p630_p5, %p618_p3  ;;  %p638_p10 = scmp.lt.s32.totalorder %s636_s21, %s629_s11 }
  0x1d   : > { %p633_p7 = pneg %p632_p6  ;;  %p639_p13 = por %p638_p10, %p637_p4 }
  0x1f   : > { %p640_p12 = pnand %p639_p13, %p633_p7 }
  0x21   : > { %643 = shalt.err (!%p640_p12)
}
  0x22   : > { %544 = dma.hbm_to_vmem [thread:$0]  (!%p861_p0), %s170_s6, 128, %s173_s8, %s159_s10  }
  0x23   : > { %p879_p5 = pnand %p517_p1, %p198_p2  ;;  %s514_s23 = sshll.u32 %s852_s28, 1 }
  0x24   : > { %s531_s29 = sshll.u32 %s752_s16, 5  ;;  %s183_s7 = scalar_lea.vmem [#allocation7], %s514_s23 }
  0x25   : > { %s191_s5 = scalar_lea.hbm %s970_s1, %s531_s29  ;;  %s193_s11 = sshll.u32 %s183_s7, 4  ;;  %s194_s11 = int_to_ptr.vmem [resolvable:$true] %s193_s11 }
  0x26   : > { %s180_s18 = scalar_lea.sflag [#allocation8], %s852_s28  ;;  %s657_s19 = scalar_lea.vmem %s194_s11, 32 }
  0x27   : > { %p658_p12 = scmp.ne.s32.totalorder %s194_s11, %s657_s19  ;;  %s759_s6 = smov [#allocation7]  }
  0x28   : > { %s662_s8 = sshll.u32 %s759_s6, 4  ;;  %s663_s8 = int_to_ptr.vmem [resolvable:$false] %s662_s8 }
  0x29   : > { %p660_p6 = pnand %p658_p12, %p618_p3  ;;  %s664_s10 = scalar_lea.vmem %s663_s8, 64 }
  0x2a   : > { %p665_p1 = scmp.lt.s32.totalorder %s194_s11, %s663_s8  ;;  %p666_p2 = scmp.lt.s32.totalorder %s664_s10, %s657_s19 }
  0x2b   : > { %p661_p7 = pneg %p660_p6 }
  0x2c   : > { %p667_p4 = por %p666_p2, %p665_p1 }
  0x2e   : > { %p668_p10 = pnand %p667_p4, %p661_p7 }
  0x30   : > { %671 = shalt.err (!%p668_p10)
}
  0x31   : > { %547 = dma.hbm_to_vmem [thread:$0]  (!%p861_p0), %s191_s5, 32, %s194_s11, %s180_s18  }
  0x32   : > { %202 = sbr.rel (%p879_p5) target bundleno = 551 (0x227), region = 28  ;;  %s897_s28 = sand.u32 (!%p879_p5), 1, %s740_s13  }
  0x33   : > { %s518_s21 = sshll.u32 (!%p879_p5), %s897_s28, 3  ;;  %s205_s23 = scalar_lea.sflag (!%p879_p5), [#allocation5], %s897_s28 }
  0x34   : > { %s208_s29 = scalar_lea.vmem (!%p879_p5), [#allocation4], %s518_s21 }
  0x37   : > { %723 = dma.done.wait (%p834_p8), %s205_s23, 128  }
  0x38   : > { %725 = vsyncadd (%p834_p8), %s205_s23, 4294967168  ;;  %s519_s9 = sshll.u32 %s897_s28, 1  ;;  %s214_s22 = scalar_lea.sflag [#allocation8], %s897_s28 }
  0x39   : > { %s217_s30 = scalar_lea.vmem [#allocation7], %s519_s9 }
  0x3a   : > { %727 = dma.done.wait (%p834_p8), %s214_s22, 32  }
  0x3b   : > { %729 = vsyncadd (%p834_p8), %s214_s22, 4294967264  ;;  %p248_p0 = scmp.eq.s32.totalorder %s748_s15, 0  ;;  %s912_s4 = scalar_lea.vmem [#allocation9], %s519_s9 }
  0x3c   : > { %vm254_vm0 = vcmask (%p248_p0), 3072   ;;  %v760_v0 = vmov (%p248_p0), -inf   ;;  %v761_v1 = vmov (%p248_p0), 0.0  }
  0x3d   : > { %253 = sbr.rel (!%p248_p0) target bundleno = 66 (0x42), region = 40  ;;  %255 = vst.msk [vmem:[#allocation2] sm:$0xf] (%p248_p0), %vm254_vm0, %v760_v0  ;;  %256 = vst.msk [vmem:[#allocation3] sm:$0xf] (%p248_p0), %vm254_vm0, %v761_v1 }
  0x42 PF: > { %v257_v2 = vld [vmem:[%s208_s29] sm:$0xff]  ;;  %v259_v3 = vlaneseq  ;;  %vm283_vm1 = vcmask 1043456   ;;  %v258_v7 = vld [vmem:[%s217_s30] sm:$0x3]  ;;  %v762_v14 = vmov 0.0   ;;  %v763_v25 = vmov 0  }
  0x43   : > { %v323_v4 = vcombine.high %v257_v2, %v257_v2  ;;  %v325_v5 = vsel %vm283_vm1, %v257_v2, -inf  ;;  %608 = vset.pattern.permute.xlu0 %v763_v25  ;;  %v764_v26 = vmov 1966171168   ;;  %vm360_vm5 = vcmask 3072   ;;  %p363_p8 = scmp.eq.s32.totalorder %s748_s15, 1 }
  0x44   : > { %v260_v6 = vshrl.u32 %v259_v3, 7  ;;  %v302_v27 = vunpack.c.l.s4 %v764_v26  ;;  %vm318_vm4 = vcmp.lt.s32.totalorder %v259_v3, 256  ;;  %v321_v42 = vld [vmem:[#allocation2] sm:$0xf]  ;;  %v765_v46 = vmov 839922192  }
  0x45   : > { %v326_v8 = vsel %vm283_vm1, %v323_v4, -inf  ;;  %v341_v47 = vunpack.c.l.s4 %v765_v46  ;;  %v331_v61 = vld [vmem:[#allocation3] sm:$0xf] }
  0x46   : > { %v263_v9 = vsub.s32 0, %v260_v6  ;;  %v267_v10 = vsub.s32 1, %v260_v6  ;;  %v327_v11 = vmax.f32 %v325_v5, %v326_v8  ;;  %v303_v32 = vunpack.c.0.s8 %v302_v27 }
  0x47   : > { %v342_v48 = vunpack.c.0.s8 %v341_v47 }
  0x48   : > { %v264_v12 = vrot.slane %v258_v7, %v263_v9  ;;  %v268_v13 = vrot.slane %v258_v7, %v267_v10  ;;  %328 = vmax.xlane.f32.xlu0 %v327_v11  ;;  %v306_v37 = vsub.s32 %v303_v32, %v260_v6 }
  0x49   : > { %v345_v49 = vsub.s32 %v342_v48, %v260_v6 }
  0x4a   : > { %vm269_vm2 = vcmp.eq.s32.totalorder %v260_v6, %v264_v12  ;;  %vm270_vm3 = vcmp.eq.s32.totalorder %v260_v6, %v268_v13 }
  0x4b   : > { %v522_v15 = vsel %vm269_vm2, 1.0, %v762_v14  ;;  %v523_v16 = vsel %vm270_vm3, 1.0, %v762_v14 }
  0x4c   : > { %v277_v17 = vcombine.low %v522_v15, %v523_v16 }
  0x4e   : > { %v279_v18 = vmul.f32 %v277_v17, %v257_v2 }
  0x50   : > { %v281_v19 = vcombine.high %v279_v18, %v279_v18  ;;  %v284_v20 = vsel %vm283_vm1, %v279_v18, 0.0 }
  0x51   : > { %v285_v21 = vrot.slane %v284_v20, 4 }
  0x52   : > { %v291_v22 = vsel %vm283_vm1, %v281_v19, 0.0 }
  0x53   : > { %v286_v23 = vadd.f32 %v285_v21, %v284_v20  ;;  %v292_v24 = vrot.slane %v291_v22, 4 }
  0x55   : > { %v287_v28 = vrot.slane %v286_v23, 2  ;;  %v293_v29 = vadd.f32 %v292_v24, %v291_v22 }
  0x57   : > { %v288_v30 = vadd.f32 %v287_v28, %v286_v23  ;;  %v294_v31 = vrot.slane %v293_v29, 2 }
  0x59   : > { %v289_v33 = vrot.slane %v288_v30, 1  ;;  %v295_v34 = vadd.f32 %v294_v31, %v293_v29 }
  0x5b   : > { %v290_v35 = vadd.f32 %v289_v33, %v288_v30  ;;  %v296_v36 = vrot.slane %v295_v34, 1 }
  0x5d   : > { %v297_v38 = vadd.f32 %v296_v36, %v295_v34 }
  0x5f   : > { %v300_v39 = vcombine.low %v290_v35, %v297_v38 }
  0x61   : > { %v307_v40 = vrot.slane %v300_v39, %v306_v37 }
  0x63   : > { %v314_v41 = vrot.slane %v307_v40, %v306_v37 }
  0x65   : > { %320 = vst.msk [vmem:[%s912_s4] sm:$0x3] %vm318_vm4, %v314_v41 }
  0xd1   : > { %v329_v43 = vpop.xlane.xlu0 %328 }
  0xd2   : > { %v330_v44 = vmax.f32 %v321_v42, %v329_v43 }
  0xd4   : > { %v332_v45 = vsub.f32 %v321_v42, %v330_v44  ;;  %362 = vst.msk [vmem:[#allocation2] sm:$0xf] %vm360_vm5, %v330_v44  ;;  %338 = vperm.xlu0 %608, %v330_v44  }
  0xd6   : > { %v333_v59 = vmul.f32 1.442695, %v332_v45 }
  0xdb   : > { %v368_v3 = vld [vmem:[#allocation2] sm:$0xf] (%p363_p8) }
 0x14f   : > { %v339_v50 = vpop.permute.xlu0 %338 }
 0x150   : > { %v346_v51 = vrot.slane %v339_v50, %v345_v49 }
 0x152   : > { %v348_v52 = vsub.f32 %v257_v2, %v346_v51 }
 0x154   : > { %v349_v53 = vmul.f32 1.442695, %v348_v52 }
 0x156   : > { %610 = vpow2.f32 %v349_v53 }
 0x157   : > { %612 = vpow2.f32 %v333_v59 }
 0x163   : > { %v611_v54 = vpop.eup %610 }
 0x164   : > { %v352_v55 = vcombine.high %v611_v54, %v611_v54  ;;  %v354_v56 = vsel %vm283_vm1, %v611_v54, 0.0  ;;  %v613_v60 = vpop.eup %612 }
 0x165   : > { %v335_v62 = vmul.f32 %v613_v60, %v331_v61 }
 0x166   : > { %v355_v57 = vsel %vm283_vm1, %v352_v55, 0.0 }
 0x167   : > { %v356_v58 = vadd.f32 %v355_v57, %v354_v56 }
 0x169   : > { %357 = vadd.xlane.f32.xlu1 %v356_v58 }
 0x1f1   : > { %367 = sbr.rel (!%p363_p8) target bundleno = 528 (0x210), region = 44 }
 0x1f2   : > { %v358_v63 = vpop.xlane.xlu1 %357 }
 0x1f3   : > { %v359_v0 = vadd.f32 %v358_v63, %v335_v62 }
 0x1f5   : > { %361 = vst.msk [vmem:[#allocation3] sm:$0xf] %vm360_vm5, %v359_v0 }
 0x1fc   : > { %v369_v1 = vld [vmem:[#allocation3] sm:$0xf] }
 0x1fd   : > { %614 = vlog2.f32 %v369_v1 }
 0x20a   : > { %v615_v2 = vpop.eup %614 }
 0x20b   : > { %v371_v4 = vmul.f32 0.6931472, %v615_v2 }
 0x20d   : > { %v372_v5 = vadd.f32 %v371_v4, %v368_v3 }
 0x20f   : > { %373 = vst.msk [vmem:[%s972_s3] sm:$0xf] %vm360_vm5, %v372_v5 }
 0x210 PF: > { %s534_s7 = sshll.u32 %s748_s15, 5  ;;  %s391_s6 = sshll.u32 %s912_s4, 4  ;;  %s392_s6 = int_to_ptr.vmem [resolvable:$true] %s391_s6 }
 0x211   : > { %s389_s19 = scalar_lea.hbm %s971_s2, %s534_s7  ;;  %s375_s8 = scalar_lea.sflag [#allocation6], %s897_s28 }
 0x212   : > { %s672_s10 = scalar_lea.vmem %s392_s6, 32  ;;  %s766_s21 = smov [#allocation9]  }
 0x213   : > { %p673_p3 = scmp.ne.s32.totalorder %s392_s6, %s672_s10  ;;  %s676_s23 = sshll.u32 %s766_s21, 4  ;;  %s677_s23 = int_to_ptr.vmem [resolvable:$false] %s676_s23 }
 0x214   : > { %s678_s29 = scalar_lea.vmem %s677_s23, 64  ;;  %p679_p12 = scmp.lt.s32.totalorder %s392_s6, %s677_s23 }
 0x215   : > { %p674_p13 = pnand %p673_p3, %p838_p9  ;;  %p680_p6 = scmp.lt.s32.totalorder %s678_s29, %s672_s10 }
 0x217   : > { %p675_p5 = pneg %p674_p13  ;;  %p681_p7 = por %p680_p6, %p679_p12 }
 0x219   : > { %p682_p1 = pnand %p681_p7, %p675_p5 }
 0x21b   : > { %685 = shalt.err (!%p682_p1)
}
 0x21c   : > { %s686_s15 = scalar_lea.hbm %s389_s19, 32  ;;  %s690_s22 = scalar_lea.hbm %s971_s2, 64 }
 0x21d   : > { %p687_p2 = scmp.ne.s32.totalorder %s389_s19, %s686_s15  ;;  %p691_p0 = scmp.lt.s32.totalorder %s389_s19, %s971_s2 }
 0x21e   : > { %p692_p8 = scmp.lt.s32.totalorder %s690_s22, %s686_s15 }
 0x21f   : > { %p688_p4 = pnand %p687_p2, %p838_p9 }
 0x220   : > { %p693_p3 = por %p692_p8, %p691_p0 }
 0x221   : > { %p689_p10 = pneg %p688_p4 }
 0x223   : > { %p694_p13 = pnand %p693_p3, %p689_p10 }
 0x225   : > { %697 = shalt.err (!%p694_p13)
}
 0x226   : > { %539 = dma.vmem_to_hbm [thread:$0]  (%p838_p9), %s392_s6, 32, %s389_s19, %s375_s8  }
 0x227 PF: > { %s409_s24 = sand.u32 1, %s736_s12   ;;  %p979_p5 = scmp.ge.s32.totalorder %s756_s17, 2 }
 0x228   : > { %s410_s5 = scalar_lea.sflag [#allocation6], %s409_s24 }
 0x229   : > { %p549_p12 = pnand %p979_p5, %p845_p11 }
 0x22b   : > { %p550_p6 = pneg %p549_p12 }
 0x22d   : > { %731 = dma.done.wait (%p550_p6), %s410_s5, 32  }
 0x22e   : > { %733 = vsyncadd (%p550_p6), %s410_s5, 4294967264  ;;  %s23_s17 = sadd.s32 1, %s756_s17   ;;  %s980_s12 = smov %s740_s13 }
 0x22f   : > { %p20_p7 = scmp.ge.s32.totalorder %s23_s17, 4   ;;  %s981_s13 = smov %s744_s14 }
 0x230   : > { %s982_s14 = smov %s843_s26  ;;  %s983_s15 = smov %s752_s16 }
 0x231   : > { %s984_s16 = smov %s986_s20  ;;  %22 = sbr.rel (!%p20_p7) target bundleno = 8 (0x8), region = 102 }
 0x236   :  { %415 = vsyncpa [#allocation5], 1 }
 0x237   :  { %417 = vsyncpa [#allocation5 + $0x1], 1 }
 0x238   :  { %418 = vsyncpa [#allocation8], 1 }
 0x239   :  { %420 = vsyncpa [#allocation8 + $0x1], 1 }
 0x23a   :  { %421 = vsyncpa [#allocation6], 1 }
 0x23b   :  { %423 = vsyncpa [#allocation6 + $0x1], 1 }

</bundles_post_ra>
